<compile_context>
chip_gen: v7x
topology: tpu7x:2x2x1
jax: 0.10.0
libtpu: 0.0.40
codegen_flags: <defaults>
</compile_context>

<pallas_src>
import jax
import jax.numpy as jnp
from jax.experimental import pallas as pl
from jax.experimental.pallas import tpu as pltpu


_NEG_LARGE = jnp.float32(-1e30)   # padded-class bias -> softmax prob exactly 0


def _srp_gp_kernel(x_ref, w_ref, b_ref, o_ref):
    """Fused Linear + Softmax on one (TB, Dp) batch tile.

    x_ref: (TB, Dp)   padded flattened input tile
    w_ref: (Dp, Np)   padded weight (in-features x classes), zero-padded
    b_ref: (1,  Np)   padded bias, padded lanes hold -1e30
    o_ref: (TB, Np)   softmax probabilities (padded lanes -> 0)
    """
    # Linear layer on the MXU, f32 accumulation.
    logits = jnp.dot(x_ref[...], w_ref[...],
                     preferred_element_type=jnp.float32) + b_ref[...]
    # Dropout(0.5): identity at inference time (see TODO above).
    # Numerically-stable softmax over the (lane-dense, 128-wide) class axis.
    m = jnp.max(logits, axis=-1, keepdims=True)
    e = jnp.exp(logits - m)                      # padded lanes: exp(-1e30-m) == 0
    s = jnp.sum(e, axis=-1, keepdims=True)
    o_ref[...] = e / s


def _round_up(n, m):
    return pl.cdiv(n, m) * m


def srp_gp_extractor_pallas(x, w, b, *, tb=8):
    """x: (B, ...) flattening to (B, temporal_len*3);  w: (4, temporal_len*3);  b: (4,)."""
    B = x.shape[0]
    x_flat = x.reshape(B, -1).astype(jnp.float32)
    D = x_flat.shape[1]
    N = w.shape[0]

    # Pad to TPU-friendly tiles: lanes multiple of 128, batch multiple of tb (8).
    Dp = _round_up(D, 128)
    Np = _round_up(N, 128)
    Bp = _round_up(B, tb)

    xp = jnp.zeros((Bp, Dp), jnp.float32).at[:B, :D].set(x_flat)
    wp = jnp.zeros((Dp, Np), jnp.float32).at[:D, :N].set(w.T.astype(jnp.float32))
    bp = jnp.full((1, Np), _NEG_LARGE, jnp.float32).at[0, :N].set(
        b.astype(jnp.float32))

    grid = (Bp // tb,)
    out = pl.pallas_call(
        _srp_gp_kernel,
        out_shape=jax.ShapeDtypeStruct((Bp, Np), jnp.float32),
        grid=grid,
        in_specs=[
            pl.BlockSpec((tb, Dp), lambda i: (i, 0)),   # batch tile of x
            pl.BlockSpec((Dp, Np), lambda i: (0, 0)),   # weights, resident
            pl.BlockSpec((1, Np), lambda i: (0, 0)),    # bias, resident
        ],
        out_specs=pl.BlockSpec((tb, Np), lambda i: (i, 0)),
        compiler_params=pltpu.CompilerParams(
            dimension_semantics=("parallel",)),
    )(xp, wp, bp)

    return out[:B, :N]


def reference(x, w, b):
    """Pure-JAX reference mirroring the PyTorch forward (eval mode)."""
    x_flat = x.reshape(x.shape[0], -1)
    logits = x_flat @ w.T + b
    return jax.nn.softmax(logits, axis=1)


if __name__ == "__main__":
    # x flattens to temporal_len * 3 features, matching nn.Linear(temporal_len*3, 4).
    B, C, T = 16, 3, 16          # temporal_len = 16  ->  in_features = 48
    N_CLASSES = 4

    key = jax.random.PRNGKey(0)
    kx, kw, kb = jax.random.split(key, 3)
    x = jax.random.normal(kx, (B, C, T), jnp.float32)
    w = jax.random.normal(kw, (N_CLASSES, C * T), jnp.float32) * 0.1
    b = jax.random.normal(kb, (N_CLASSES,), jnp.float32) * 0.1

    out = srp_gp_extractor_pallas(x, w, b)
    jax.block_until_ready(out)

    ref = reference(x, w, b)
    assert out.shape == (B, N_CLASSES), out.shape
    assert jnp.allclose(out, ref, atol=1e-5, rtol=1e-5)
    assert jnp.allclose(jnp.sum(out, axis=1), jnp.ones((B,)), atol=1e-5)

    print("KERNEL_OK")
</pallas_src>

<mosaic_0001>
module attributes {stable_mosaic.version = 11 : i64} {
  func.func @_srp_gp_kernel(%arg0: i32, %arg1: memref<8x128xf32, #tpu.memory_space<vmem>>, %arg2: memref<128x128xf32, #tpu.memory_space<vmem>>, %arg3: memref<1x128xf32, #tpu.memory_space<vmem>>, %arg4: memref<8x128xf32, #tpu.memory_space<vmem>>) attributes {dimension_semantics = [#tpu.dimension_semantics<parallel>], iteration_bounds = array<i64: 2>, scalar_prefetch = 0 : i64, scratch_operands = 0 : i64, tpu.core_type = #tpu.core_type<tc>, window_params = [{transform_indices = @transform_0, window_bounds = array<i64: 8, 128>}, {pipeline_mode = #tpu.pipeline_mode<synchronous>, transform_indices = @transform_1, window_bounds = array<i64: 128, 128>}, {pipeline_mode = #tpu.pipeline_mode<synchronous>, transform_indices = @transform_2, window_bounds = array<i64: 1, 128>}, {transform_indices = @transform_3, window_bounds = array<i64: 8, 128>}]} {
    %c0 = arith.constant 0 : index
    %c0_0 = arith.constant 0 : index
    %0 = vector.load %arg1[%c0, %c0_0] : memref<8x128xf32, #tpu.memory_space<vmem>>, vector<8x128xf32>
    %c0_1 = arith.constant 0 : index
    %c0_2 = arith.constant 0 : index
    %1 = vector.load %arg2[%c0_1, %c0_2] : memref<128x128xf32, #tpu.memory_space<vmem>>, vector<128x128xf32>
    %cst = arith.constant dense<0.000000e+00> : vector<8x128xf32>
    %2 = tpu.matmul %0, %1, %cst {dimension_numbers = #tpu.dot_dimension_numbers<[1], [0], [0], [1], [0, 0, 1, 1], [], []>} : vector<8x128xf32>, vector<128x128xf32>, vector<8x128xf32> -> vector<8x128xf32>
    %c0_3 = arith.constant 0 : index
    %c0_4 = arith.constant 0 : index
    %3 = vector.load %arg3[%c0_3, %c0_4] : memref<1x128xf32, #tpu.memory_space<vmem>>, vector<1x128xf32>
    %4 = vector.broadcast %3 : vector<1x128xf32> to vector<8x128xf32>
    %5 = arith.addf %2, %4 : vector<8x128xf32>
    %cst_5 = arith.constant dense<0xFF800000> : vector<8xf32>
    %6 = vector.multi_reduction <maximumf>, %5, %cst_5 [1] : vector<8x128xf32> to vector<8xf32>
    %7 = vector.shape_cast %6 : vector<8xf32> to vector<8x1xf32>
    %8 = vector.broadcast %7 : vector<8x1xf32> to vector<8x128xf32>
    %9 = arith.subf %5, %8 : vector<8x128xf32>
    %10 = math.exp %9 : vector<8x128xf32>
    %cst_6 = arith.constant dense<0.000000e+00> : vector<8xf32>
    %11 = vector.multi_reduction <add>, %10, %cst_6 [1] : vector<8x128xf32> to vector<8xf32>
    %12 = vector.shape_cast %11 : vector<8xf32> to vector<8x1xf32>
    %13 = vector.broadcast %12 : vector<8x1xf32> to vector<8x128xf32>
    %14 = arith.divf %10, %13 : vector<8x128xf32>
    %c0_7 = arith.constant 0 : index
    %c0_8 = arith.constant 0 : index
    %15 = vector.load %arg4[%c0_7, %c0_8] : memref<8x128xf32, #tpu.memory_space<vmem>>, vector<8x128xf32>
    tpu.vector_store %arg4[%c0_7, %c0_8], %14 {strides = array<i32>} : memref<8x128xf32, #tpu.memory_space<vmem>>, vector<8x128xf32>,
    return
  }
  func.func @transform_0(%arg0: i32) -> (i32, i32) {
    %c0_i32 = arith.constant 0 : i32
    %c0_i32_0 = arith.constant 0 : i32
    return %arg0, %c0_i32 : i32, i32
  }
  func.func @transform_1(%arg0: i32) -> (i32, i32) {
    %c0_i32 = arith.constant 0 : i32
    %c0_i32_0 = arith.constant 0 : i32
    %c0_i32_1 = arith.constant 0 : i32
    return %c0_i32, %c0_i32_0 : i32, i32
  }
  func.func @transform_2(%arg0: i32) -> (i32, i32) {
    %c0_i32 = arith.constant 0 : i32
    %c0_i32_0 = arith.constant 0 : i32
    %c0_i32_1 = arith.constant 0 : i32
    return %c0_i32, %c0_i32_0 : i32, i32
  }
  func.func @transform_3(%arg0: i32) -> (i32, i32) {
    %c0_i32 = arith.constant 0 : i32
    %c0_i32_0 = arith.constant 0 : i32
    return %arg0, %c0_i32 : i32, i32
  }
}

</mosaic_0001>

<bundles_post_ra>
// kernel: tpu_custom_call.1
= control target key start
LH: loop header
LB: loop body
LE: loop exit
PB: predicated region body
PF: predicated region fallthrough
CT: control target
= control target key end

     0   :  { %8 = vsyncpa [#allocation3], 0  ;;  %s920_s0 = inlined_call_operand.hbm [shape: f32[16,128], index: 0, kind: input, shape index: {}]   ;;  %s921_s1 = inlined_call_operand.hbm [shape: f32[128,128], index: 1, kind: input, shape index: {}]   ;;  %s922_s2 = inlined_call_operand.vmem [shape: f32[1,128], index: 2, kind: input, shape index: {}]   ;;  %s923_s3 = inlined_call_operand.hbm [shape: f32[16,128], index: 3, kind: output, shape index: {}]  }
   0x1   :  { %10 = vsyncpa [#allocation3 + $0x1], 0 }
   0x2   :  { %11 = vsyncpa [#allocation6], 0 }
   0x3   :  { %12 = vsyncpa [#allocation4], 0 }
   0x4   :  { %14 = vsyncpa [#allocation4 + $0x1], 0  ;;  %s714_s12 = smov 0   ;;  %s716_s13 = smov 0  }
   0x5   :  { %s718_s14 = smov 0   ;;  %s720_s15 = smov 0  }
   0x6 LB: > { %s735_s16 = sadd.s32 4294967295, %s684_s15   ;;  %s399_s17 = sadd.s32 4294967294, %s684_s15   ;;  %s684_s15 = sphi %s720_s15, %s943_s15   ;;  %s680_s14 = sphi %s718_s14, %s942_s14   ;;  %s676_s13 = sphi %s716_s13, %s941_s13   ;;  %s672_s12 = sphi %s714_s12, %s940_s12  }
   0x7   : > { %p40_p0 = scmp.ne.s32.totalorder %s676_s13, %s672_s12  ;;  %p924_p1 = scmp.eq.s32.totalorder %s735_s16, 0 }
   0x8   : > { %p112_p3 = scmp.eq.s32.totalorder %s399_s17, 1  ;;  %p400_p5 = scmp.ge.s32.totalorder %s684_s15, 1 }
   0x9   : > { %p744_p4 = por %p924_p1, %p40_p0  ;;  %p119_p7 = scmp.lt.s32.totalorder %s684_s15, 3 }
   0xa   : > { %p749_p6 = por %p112_p3, %p40_p0  ;;  %s686_s21 = smov [#allocation5]  }
   0xb   : > { %s927_s18 = scalar_select %p744_p4, 1, 0 }
   0xc   : > { %s928_s19 = scalar_select %p749_p6, 1, 0 }
   0xd   : > { %p754_p8 = pnand %p400_p5, %p119_p7  ;;  %s131_s22 = sshll.u32 %s686_s21, 4  ;;  %s758_s22 = int_to_ptr.vmem [resolvable:$true] %s131_s22 }
   0xe   : > { %s770_s24 = sadd.s32 1, %s684_s15   ;;  %s27_s25 = sadd.s32 1, %s680_s14 }
   0xf   : > { %s929_s20 = scalar_select %p754_p8, 1, 0 }
  0x10   : > { %p498_p9 = pneg %p754_p8  ;;  %s24_s26 = ssub.s32 %s684_s15, %s770_s24 }
  0x11   : > { %s556_s29 = scalar_lea.hbm %s921_s1, 2048 }
  0x12   : > { %p765_p11 = pnand %p498_p9, %p924_p1  ;;  %p557_p12 = scmp.ne.s32.totalorder %s921_s1, %s556_s29 }
  0x13   : > { %p563_p5 = scmp.lt.u32.totalorder %s556_s29, %s921_s1 }
  0x14   : > { %p558_p13 = pneg %p765_p11 }
  0x16   : > { %p559_p0 = pnand %p558_p13, %p557_p12 }
  0x18   : > { %p560_p3 = pneg %p559_p0 }
  0x1a   : > { %p565_p7 = pnand %p563_p5, %p560_p3 }
  0x1c   : > { %568 = shalt.err (!%p565_p7)
}
  0x1d   : > { %s569_s7 = scalar_lea.vmem %s758_s22, 2048  ;;  %p577_p2 = scmp.lt.s32.totalorder %s758_s22, %s758_s22 }
  0x1e   : > { %p570_p9 = scmp.ne.s32.totalorder %s758_s22, %s569_s7  ;;  %p578_p6 = scmp.lt.s32.totalorder %s569_s7, %s569_s7 }
  0x20   : > { %p572_p10 = pnand %p570_p9, %p558_p13  ;;  %p579_p4 = por %p578_p6, %p577_p2 }
  0x22   : > { %p573_p1 = pneg %p572_p10 }
  0x24   : > { %p580_p8 = pnand %p579_p4, %p573_p1 }
  0x26   : > { %583 = shalt.err (!%p580_p8)
}
  0x27   : > { %s687_s8 = smov 128   ;;  %s688_s9 = smov 8  }
  0x28   : > { %501 = dma.hbm_to_vmem [thread:$0]  (!%p765_p11), %s921_s1, 2048, %s758_s22, [#allocation6], %s687_s8, %s687_s8, %s688_s9  }
  0x29   : > { %p25_p2 = scmp.eq.s32.totalorder %s24_s26, 0  ;;  %p34_p1 = scmp.ne.s32.totalorder %s680_s14, %s676_s13 }
  0x2a   : > { %p35_p4 = scmp.eq.s32.totalorder %s684_s15, 0  ;;  %p511_p6 = scmp.lt.s32.totalorder %s684_s15, 2 }
  0x2b   : > { %s801_s17 = scalar_select %p25_p2, %s680_s14, %s27_s25  }
  0x2c   : > { %p36_p8 = por %p35_p4, %p34_p1  ;;  %p931_p10 = scmp.eq.s32.totalorder %s735_s16, 1 }
  0x2d   : > { %s148_s27 = sand.u32 1, %s680_s14   ;;  %s404_s28 = sshll.u32 %s684_s15, 7 }
  0x2e   : > { %p805_p12 = por %p931_p10, %p34_p1  ;;  %s403_s29 = sshll.u32 %s148_s27, 3 }
  0x2f   : > { %s814_s4 = scalar_lea.hbm %s920_s0, %s404_s28  ;;  %s152_s22 = scalar_lea.vmem [#allocation2], %s403_s29 }
  0x30   : > { %s159_s25 = sshll.u32 %s152_s22, 4  ;;  %p816_p11 = pnand %p511_p6, %p36_p8  ;;  %s820_s25 = int_to_ptr.vmem [resolvable:$true] %s159_s25 }
  0x31   : > { %s149_s5 = scalar_lea.sflag [#allocation3], %s148_s27  ;;  %s584_s6 = scalar_lea.hbm %s814_s4, 128 }
  0x32   : > { %p585_p13 = scmp.ne.s32.totalorder %s814_s4, %s584_s6  ;;  %p586_p0 = pneg %p816_p11 }
  0x33   : > { %s589_s9 = scalar_lea.hbm %s920_s0, 256  ;;  %p590_p7 = scmp.lt.u32.totalorder %s814_s4, %s920_s0 }
  0x34   : > { %p587_p3 = pnand %p586_p0, %p585_p13  ;;  %p591_p9 = scmp.lt.u32.totalorder %s589_s9, %s584_s6 }
  0x35   : > { %p593_p1 = scmp.lt.u32.totalorder %s584_s6, %s814_s4 }
  0x36   : > { %p588_p5 = pneg %p587_p3  ;;  %p592_p2 = por %p591_p9, %p590_p7 }
  0x38   : > { %p594_p4 = por %p593_p1, %p592_p2 }
  0x3a   : > { %p595_p6 = pnand %p594_p4, %p588_p5 }
  0x3c   : > { %598 = shalt.err (!%p595_p6)
}
  0x3d   : > { %s599_s27 = scalar_lea.vmem %s820_s25, 128  ;;  %s689_s28 = smov [#allocation2]  }
  0x3e   : > { %p600_p8 = scmp.ne.s32.totalorder %s820_s25, %s599_s27  ;;  %s604_s29 = sshll.u32 %s689_s28, 4  ;;  %s605_s29 = int_to_ptr.vmem [resolvable:$false] %s604_s29 }
  0x3f   : > { %s606_s23 = scalar_lea.vmem %s605_s29, 256  ;;  %p607_p3 = scmp.lt.s32.totalorder %s820_s25, %s605_s29 }
  0x40   : > { %p602_p10 = pnand %p600_p8, %p586_p0  ;;  %p608_p7 = scmp.lt.s32.totalorder %s606_s23, %s599_s27 }
  0x42   : > { %p603_p13 = pneg %p602_p10  ;;  %p609_p9 = por %p608_p7, %p607_p3 }
  0x44   : > { %p610_p2 = pnand %p609_p9, %p603_p13 }
  0x46   : > { %613 = shalt.err (!%p610_p2)
}
  0x47   : > { %505 = dma.hbm_to_vmem [thread:$0]  (!%p816_p11), %s814_s4, 128, %s820_s25, %s149_s5  }
  0x48   : > { %p934_p5 = scmp.ne.s32.totalorder %s929_s20, 0 }
  0x49   : > { %s850_s30 = sand.u32 (!%p934_p5), 1, %s676_s13   ;;  %p935_p0 = scmp.ne.s32.totalorder (!%p934_p5), %s927_s18, 0 }
  0x4a   : > { %168 = sbr.rel (%p934_p5) target bundleno = 659 (0x293), region = 32  ;;  %s406_s22 = sshll.u32 (!%p934_p5), %s850_s30, 3 }
  0x4b   : > { %s171_s6 = scalar_lea.sflag (!%p934_p5), [#allocation3], %s850_s30  ;;  %s856_s7 = scalar_lea.vmem (!%p934_p5), [#allocation2], %s406_s22 }
  0x51   : > { %659 = dma.done.wait (%p935_p0), %s171_s6, 128  }
  0x52   : > { %661 = vsyncadd (%p935_p0), %s171_s6, 4294967168  ;;  %p936_p11 = scmp.eq.s32.totalorder %s735_s16, 0 }
  0x54   : > { %663 = dma.done.wait (%p936_p11), [#allocation6], 2048   ;;  %p937_p1 = pmov %p936_p11 }
  0x55   : > { %v690_v0 = vmov 0.0|0.0   ;;  %vm691_vm0 = vmmov 0   ;;  %v692_v1 = vmov 0.0   ;;  %v202_v2 = vld [vmem:[#allocation5] sm:$0xff]  ;;  %v203_v3 = vld [vmem:[#allocation5 + $0x8] sm:$0xff]  ;;  %v204_v4 = vld [vmem:[#allocation5 + $0x10] sm:$0xff] }
  0x56   : > { %665 = vsyncadd (%p937_p1), [#allocation6], 4294965248  ;;  %466 = vmatprep.subr.bf16.mxu0 %v690_v0  ;;  %463 = vmatprep.mubr.msk.f32.mxu0 %vm691_vm0, %v692_v1  ;;  %v467_v5 = vpack.c.bf16 %v203_v3, %v202_v2  ;;  %v205_v6 = vld [vmem:[#allocation5 + $0x18] sm:$0xff]  ;;  %v206_v8 = vld [vmem:[#allocation5 + $0x20] sm:$0xff]  ;;  %s411_s4 = sshll.u32 %s735_s16, 7  ;;  %s200_s25 = scalar_lea.vmem [#allocation7], %s406_s22 }
  0x57   : > { %v470_v7 = vpack.c.bf16 %v205_v6, %v204_v4  ;;  %v207_v9 = vld [vmem:[#allocation5 + $0x28] sm:$0xff]  ;;  %v208_v11 = vld [vmem:[#allocation5 + $0x30] sm:$0xff]  ;;  %v209_v12 = vld [vmem:[#allocation5 + $0x38] sm:$0xff]  ;;  %s319_s26 = sshll.u32 %s200_s25, 4  ;;  %s876_s9 = scalar_lea.hbm %s923_s3, %s411_s4  ;;  %s878_s26 = int_to_ptr.vmem [resolvable:$true] %s319_s26 }
  0x58   : > { %468 = vmatpush3.bf16.msra.mxu0 %v467_v5  ;;  %v473_v10 = vpack.c.bf16 %v207_v9, %v206_v8  ;;  %v476_v13 = vpack.c.bf16 %v209_v12, %v208_v11  ;;  %v210_v14 = vld [vmem:[#allocation5 + $0x40] sm:$0xff]  ;;  %v211_v15 = vld [vmem:[#allocation5 + $0x48] sm:$0xff]  ;;  %v212_v17 = vld [vmem:[#allocation5 + $0x50] sm:$0xff]  ;;  %s306_s10 = scalar_lea.sflag [#allocation4], %s850_s30  ;;  %s614_s11 = scalar_lea.vmem %s878_s26, 128 }
  0x59   : > { %469 = vmatprep.subr.bf16.mxu0 %v690_v0  ;;  %v479_v16 = vpack.c.bf16 %v211_v15, %v210_v14  ;;  %v213_v18 = vld [vmem:[#allocation5 + $0x58] sm:$0xff]  ;;  %v214_v20 = vld [vmem:[#allocation5 + $0x60] sm:$0xff]  ;;  %v215_v21 = vld [vmem:[#allocation5 + $0x68] sm:$0xff]  ;;  %p615_p4 = scmp.ne.s32.totalorder %s878_s26, %s614_s11  ;;  %s693_s16 = smov [#allocation7]  }
  0x5a   : > { %v482_v19 = vpack.c.bf16 %v213_v18, %v212_v17  ;;  %v485_v22 = vpack.c.bf16 %v215_v21, %v214_v20  ;;  %v216_v23 = vld [vmem:[#allocation5 + $0x70] sm:$0xff]  ;;  %v217_v24 = vld [vmem:[#allocation5 + $0x78] sm:$0xff]  ;;  %s618_s27 = sshll.u32 %s693_s16, 4  ;;  %s619_s27 = int_to_ptr.vmem [resolvable:$false] %s618_s27 }
  0x5b   : > { %v488_v25 = vpack.c.bf16 %v217_v24, %v216_v23  ;;  %v201_v26 = vld [vmem:[%s856_s7] sm:$0xff]  ;;  %p616_p6 = pnand %p615_p4, %p805_p12  ;;  %s620_s28 = scalar_lea.vmem %s619_s27, 256 }
  0x5c   : > { %471 = vmatpush3.bf16.msra.mxu0 %v470_v7  ;;  %v409_v27 = vld [vmem:[%s922_s2] ss:$0 sm:$0xff]  ;;  %p621_p10 = scmp.lt.s32.totalorder %s878_s26, %s619_s27  ;;  %p622_p13 = scmp.lt.s32.totalorder %s620_s28, %s614_s11 }
  0x5d   : > { %472 = vmatprep.subr.bf16.mxu0 %v690_v0  ;;  %p617_p8 = pneg %p616_p6 }
  0x5e   : > { %p623_p3 = por %p622_p13, %p621_p10 }
  0x60   : > { %474 = vmatpush3.bf16.msra.mxu0 %v473_v10  ;;  %p624_p7 = pnand %p623_p3, %p617_p8 }
  0x61   : > { %475 = vmatprep.subr.bf16.mxu0 %v690_v0 }
  0x64   : > { %477 = vmatpush3.bf16.msra.mxu0 %v476_v13 }
  0x65   : > { %478 = vmatprep.subr.bf16.mxu0 %v690_v0 }
  0x68   : > { %480 = vmatpush3.bf16.msra.mxu0 %v479_v16 }
  0x69   : > { %481 = vmatprep.subr.bf16.mxu0 %v690_v0 }
  0x6c   : > { %483 = vmatpush3.bf16.msra.mxu0 %v482_v19 }
  0x6d   : > { %484 = vmatprep.subr.bf16.mxu0 %v690_v0 }
  0x70   : > { %486 = vmatpush3.bf16.msra.mxu0 %v485_v22 }
  0x71   : > { %487 = vmatprep.subr.bf16.mxu0 %v690_v0 }
  0x74   : > { %489 = vmatpush3.bf16.msra.mxu0 %v488_v25 }
  0x77   : > { %464 = vmatmul.mubr.f32.vlgmr.msra.gmra.mrb[0].mxu0 %v201_v26 }
 0x14a   : > { %v291_v28 = vpop.f32.mrb[0].mxu0 }
 0x14b   : > { %v292_v29 = vadd.f32 %v409_v27, %v291_v28  ;;  %v465_v30 = vpop.f32.mrb[1].mxu0 }
 0x14d   : > { %295 = vmax.xlane.f32.xlu0 %v292_v29 }
 0x1da   : > { %v296_v31 = vpop.xlane.xlu0 %295 }
 0x1db   : > { %v297_v32 = vsub.f32 %v292_v29, %v296_v31 }
 0x1dd   : > { %v298_v33 = vmul.f32 1.442695, %v297_v32 }
 0x1df   : > { %552 = vpow2.f32 %v298_v33 }
 0x1e9   : > { %v553_v34 = vpop.eup %552 }
 0x1ea   : > { %300 = vadd.xlane.f32.xlu0 %v553_v34 }
 0x277   : > { %v301_v35 = vpop.xlane.xlu0 %300 }
 0x278   : > { %554 = vrcp.f32 %v301_v35 }
 0x282   : > { %v555_v36 = vpop.eup %554 }
 0x283   : > { %v303_v37 = vmul.f32 %v555_v36, %v553_v34 }
 0x285   : > { %304 = vst [vmem:[%s200_s25] sm:$0xff] %v303_v37 }
 0x286   : > { %627 = shalt.err (!%p624_p7)
}
 0x287   : > { %s628_s29 = scalar_lea.hbm %s876_s9, 128  ;;  %s632_s22 = scalar_lea.hbm %s923_s3, 256 }
 0x288   : > { %p629_p9 = scmp.ne.s32.totalorder %s876_s9, %s628_s29  ;;  %p633_p0 = scmp.lt.u32.totalorder %s876_s9, %s923_s3 }
 0x289   : > { %p634_p11 = scmp.lt.u32.totalorder %s632_s22, %s628_s29  ;;  %p636_p4 = scmp.lt.u32.totalorder %s628_s29, %s876_s9 }
 0x28a   : > { %p630_p2 = pnand %p629_p9, %p805_p12 }
 0x28b   : > { %p635_p1 = por %p634_p11, %p633_p0 }
 0x28c   : > { %p631_p5 = pneg %p630_p2 }
 0x28d   : > { %p637_p6 = por %p636_p4, %p635_p1 }
 0x28f   : > { %p638_p8 = pnand %p637_p6, %p631_p5 }
 0x291   : > { %641 = shalt.err (!%p638_p8)
}
 0x292   : > { %496 = dma.vmem_to_hbm [thread:$0]  (%p805_p12), %s878_s26, 128, %s876_s9, %s306_s10  }
 0x293 PF: > { %s331_s18 = sand.u32 1, %s672_s12   ;;  %p938_p10 = scmp.ne.s32.totalorder %s928_s19, 0 }
 0x294   : > { %p939_p13 = scmp.ge.s32.totalorder %s684_s15, 2  ;;  %s332_s20 = scalar_lea.sflag [#allocation4], %s331_s18 }
 0x296   : > { %p507_p3 = pnand %p939_p13, %p938_p10 }
 0x298   : > { %667 = dma.done.wait (!%p507_p3), %s332_s20, 128  }
 0x299   : > { %669 = vsyncadd (!%p507_p3), %s332_s20, 4294967168  ;;  %p17_p7 = scmp.ge.s32.totalorder %s770_s24, 4   ;;  %s940_s12 = smov %s676_s13 }
 0x29a   : > { %s941_s13 = smov %s680_s14  ;;  %s942_s14 = smov %s801_s17 }
 0x29b   : > { %s943_s15 = smov %s770_s24  ;;  %19 = sbr.rel (!%p17_p7) target bundleno = 6 (0x6), region = 81 }
 0x2a2   :  { %337 = vsyncpa [#allocation3], 1 }
 0x2a3   :  { %339 = vsyncpa [#allocation3 + $0x1], 1 }
 0x2a4   :  { %340 = vsyncpa [#allocation6], 1 }
 0x2a5   :  { %341 = vsyncpa [#allocation4], 1 }
 0x2a6   :  { %343 = vsyncpa [#allocation4 + $0x1], 1 }

</bundles_post_ra>
